<compile_context>
chip_gen: v6e
topology: v6e:2x2x1
jax: 0.10.0
libtpu: 0.0.40
codegen_flags: <defaults>
</compile_context>

<pallas_src>
import functools

import jax
import jax.numpy as jnp
from jax import lax
from jax.experimental import pallas as pl
from jax.experimental.pallas import tpu as pltpu


def _nao_epd_attention_kernel(out_ref, ctx_ref, w_mix_ref, w_out_ref, b_ref,
                              y_ref, attn_ref, *, mxu_dtype):
    """One (batch b, query-tile q) grid step.

    out_ref  : (1, TQ, H)     query-row tile of the decoder `output`
    ctx_ref  : (1, T_in, H)   this batch element's encoder `context`
    w_mix_ref: (H, H)         linear weight half acting on `mix`
    w_out_ref: (H, H)         linear weight half acting on `output`
    b_ref    : (1, H)         linear bias
    y_ref    : (1, TQ, H)     tanh(linear_out(cat(mix, output)))
    attn_ref : (1, TQ, T_in)  softmax attention weights
    """
    out_t = out_ref[0]                      # (TQ, H)
    ctx_t = ctx_ref[0]                      # (T_in, H)
    out_mm = out_t.astype(mxu_dtype)
    ctx_mm = ctx_t.astype(mxu_dtype)

    # scores = output @ context^T: contract the last dim of both operands so
    # the MXU is fed directly and no transposed (T_in, H) tile is ever
    # materialized (no XLU copy).
    scores = lax.dot_general(
        out_mm, ctx_mm,
        dimension_numbers=(((1,), (1,)), ((), ())),
        preferred_element_type=jnp.float32)             # (TQ, T_in) f32

    # TODO(synk): self.mask (masked_fill_ with -inf) is None for this module's
    # usage; a boolean mask input would be applied with jnp.where here.

    # Row softmax over input_size == F.softmax(attn.view(-1, T_in), dim=1).
    m = jnp.max(scores, axis=-1, keepdims=True)
    e = jnp.exp(scores - m)
    denom = jnp.sum(e, axis=-1, keepdims=True)
    # Exact divide: lowers to EUP reciprocal + Newton refinement on hardware;
    # the earlier approx-reciprocal shortcut cost ~1e-5 of accuracy and broke
    # the reference check.
    attn = e / denom                                    # (TQ, T_in) f32

    # mix = attn @ context -> (TQ, H), f32 accumulation on the MXU.
    mix = jnp.dot(attn.astype(mxu_dtype), ctx_mm,
                  preferred_element_type=jnp.float32)

    # linear_out(cat(mix, output)) == mix @ W_mix + output @ W_out + b
    w_dtype = w_mix_ref.dtype
    lin = (jnp.dot(mix.astype(w_dtype), w_mix_ref[...],
                   preferred_element_type=jnp.float32)
           + jnp.dot(out_t.astype(w_dtype), w_out_ref[...],
                     preferred_element_type=jnp.float32)
           + b_ref[0].astype(jnp.float32))

    # Rows past T_out in a trailing partial tile hold undefined data; they are
    # row-independent and their writes are masked, so no extra masking needed.
    y_ref[0] = jnp.tanh(lin).astype(y_ref.dtype)
    attn_ref[0] = attn.astype(attn_ref.dtype)


def _sublane_multiple(itemsize):
    # Sub-32-bit dtypes pack along sublanes: f32 -> 8 rows, bf16 -> 16, 1B -> 32.
    return max(8, 32 // max(1, itemsize))


def _usable_vmem_bytes():
    """Generation-aware scoped-VMEM budget (per TensorCore)."""
    try:
        capacity = int(pltpu.get_tpu_info().vmem_capacity_bytes)
    except Exception:
        capacity = 64 * 1024 * 1024        # conservative default: v7x (64 MiB / TC)
    capacity = max(capacity, 64 * 1024 * 1024)
    # Leave headroom for compiler scratch / internal buffers:
    # ~50 MiB of v7x's 64 MiB, ~100 MiB of v5e/v6e's 128 MiB.
    return min(int(capacity * 0.78), capacity - (12 << 20))


def _vmem_footprint_bytes(tq, t_in, h, act_isz, attn_isz, w_isz):
    # Conservative model: every operand double-buffered (invariant weights /
    # bias and large contexts are actually single-buffered when pl.Buffered(1)
    # is accepted -- see nao_epd_attention).
    ctx = 2 * t_in * h * act_isz
    wgt = 2 * (2 * h * h + h) * w_isz
    io = 2 * (2 * tq * h * act_isz + tq * t_in * attn_isz)   # out + y + attn windows
    tmp = tq * t_in * 8 + tq * h * 8                         # f32 scores/attn, mix/lin
    return ctx + wgt + io + tmp


def _choose_tq(t_out, t_in, h, act_isz, attn_isz, w_isz, vmem_budget):
    """Largest query tile (dtype-aware sublane multiple, <=1024 rows) whose
    footprint fits the per-generation VMEM budget."""
    sub = _sublane_multiple(act_isz)
    if t_out <= sub:
        return t_out                      # block equals the full dim -> always legal
    budget = vmem_budget - (6 << 20)      # compiler-scratch headroom
    tq = min((t_out // sub) * sub, 1024)
    while tq > sub and _vmem_footprint_bytes(tq, t_in, h, act_isz, attn_isz, w_isz) > budget:
        tq = max(sub, ((tq // 2) // sub) * sub)
    return tq


def prepare_nao_epd_attention_params(weight, bias, *, weight_dtype=None):
    """One-time parameter prep (hoist out of serving/training hot loops).

    weight: (H, 2H) -- PyTorch nn.Linear(dim*2, dim).weight, layout (out, in).
    bias  : (H,)
    Returns (w_mix, w_out, b2d): (in, out)-layout weight halves acting on `mix`
    and on `output` (matching cat((mix, output), dim=2)), plus a 2-D bias.
    """
    h = weight.shape[0]
    w_t = weight.T                        # (2H, H)
    if weight_dtype is not None:
        w_t = w_t.astype(weight_dtype)
    return w_t[:h, :], w_t[h:, :], bias.reshape(1, h)


def nao_epd_attention(output, context, weight=None, bias=None, *,
                      mxu_dtype=None, prepared_params=None):
    """Pallas implementation of NaoEpdAttention.forward (mask=None).

    output : (B, T_out, H)   decoder hidden states
    context: (B, T_in,  H)   encoder hidden states
    weight : (H, 2H)         nn.Linear(dim*2, dim).weight (or pass prepared_params)
    bias   : (H,)            nn.Linear(dim*2, dim).bias
    mxu_dtype: optional matmul-input dtype (e.g. jnp.bfloat16 to trade input
        rounding for 3-6x MXU throughput on f32 activations).  Default: the
        activation dtype (exact for f32).
    Returns (y, attn): y (B, T_out, H), attn (B, T_out, T_in), both in the
        activation dtype (softmax math stays f32 in-kernel; bf16 activations
        halve the dominant attn HBM write stream).
    """
    B, T_out, H = output.shape
    _, T_in, _ = context.shape

    act_dtype = jnp.dtype(output.dtype)
    mxu = act_dtype if mxu_dtype is None else jnp.dtype(mxu_dtype)

    if prepared_params is None:
        w_dt = mxu if (weight is not None and
                       mxu.itemsize < jnp.dtype(weight.dtype).itemsize) else None
        prepared_params = prepare_nao_epd_attention_params(weight, bias, weight_dtype=w_dt)
    w_mix, w_out, b2d = prepared_params

    attn_dtype = act_dtype
    act_isz = act_dtype.itemsize
    attn_isz = jnp.dtype(attn_dtype).itemsize
    w_isz = jnp.dtype(w_mix.dtype).itemsize

    vmem_budget = _usable_vmem_bytes()
    TQ = _choose_tq(T_out, T_in, H, act_isz, attn_isz, w_isz, vmem_budget)
    nq = pl.cdiv(T_out, TQ)
    vmem_limit = int(min(
        vmem_budget,
        max(32 << 20,
            _vmem_footprint_bytes(TQ, T_in, H, act_isz, attn_isz, w_isz) + (8 << 20))))

    # Megacore (v7x, 2 TCs): shard only the batch axis when B >= 2 so both
    # cores do not each hold and re-fetch the same batch's resident context.
    dim_sem = ("parallel", "arbitrary") if B >= 2 else ("parallel", "parallel")

    # Single-buffer a large per-batch context (accept one DMA bubble per batch
    # boundary) instead of double-buffering T_in*H bytes (matters on v7x).
    single_buffer_ctx = T_in * H * act_isz > (8 << 20)

    # TODO(synk): for encoder sequences where T_in*H alone exceeds the VMEM
    # budget, add an inner "arbitrary" grid axis over T_in tiles with a
    # two-pass online softmax so per-step VMEM stops scaling with T_in.

    kernel = functools.partial(_nao_epd_attention_kernel, mxu_dtype=mxu)

    # NOTE: attn is the dominant HBM write stream -- keep T_in (and H) a
    # multiple of 128 caller-side so its stores stay lane-dense (unmasked vst).

    def run(use_single_buffering):
        def inv_spec(shape):
            if use_single_buffering:
                # Grid-invariant operand: double buffers are pure VMEM waste.
                return pl.BlockSpec(shape, lambda b, q: (0, 0),
                                    pipeline_mode=pl.Buffered(1))
            return pl.BlockSpec(shape, lambda b, q: (0, 0))

        ctx_kwargs = ({"pipeline_mode": pl.Buffered(1)}
                      if (use_single_buffering and single_buffer_ctx) else {})

        grid_spec = pltpu.PrefetchScalarGridSpec(
            num_scalar_prefetch=0,
            grid=(B, nq),
            in_specs=[
                pl.BlockSpec((1, TQ, H), lambda b, q: (b, q, 0)),
                pl.BlockSpec((1, T_in, H), lambda b, q: (b, 0, 0), **ctx_kwargs),
                inv_spec((H, H)),        # w_mix (grid-invariant)
                inv_spec((H, H)),        # w_out (grid-invariant)
                inv_spec((1, H)),        # bias  (grid-invariant)
            ],
            out_specs=[
                pl.BlockSpec((1, TQ, H), lambda b, q: (b, q, 0)),
                pl.BlockSpec((1, TQ, T_in), lambda b, q: (b, q, 0)),
            ],
        )
        return pl.pallas_call(
            kernel,
            out_shape=(
                jax.ShapeDtypeStruct((B, T_out, H), act_dtype),
                jax.ShapeDtypeStruct((B, T_out, T_in), attn_dtype),
            ),
            grid_spec=grid_spec,
            compiler_params=pltpu.CompilerParams(
                dimension_semantics=dim_sem,
                vmem_limit_bytes=vmem_limit,
            ),
        )(output, context, w_mix, w_out, b2d)

    try:
        return run(True)
    except Exception:
        # pl.Buffered(1) single-buffering not accepted by this jax/backend
        # build (e.g. the TPU interpreter): fall back to default pipelining.
        return run(False)


def _reference(output, context, weight, bias):
    # Pure-JAX mirror of the PyTorch forward (mask=None), evaluated at
    # "highest" matmul precision so the f32 comparison is meaningful on TPU.
    with jax.default_matmul_precision("highest"):
        scores = jnp.einsum("bth,bsh->bts", output, context)
        attn = jax.nn.softmax(scores, axis=-1)
        mix = jnp.einsum("bts,bsh->bth", attn, context)
        combined = jnp.concatenate([mix, output], axis=-1)
        y = jnp.tanh(combined @ weight.T + bias)
    return y, attn


if __name__ == "__main__":
    key = jax.random.PRNGKey(0)
    B, T_out, T_in, H = 2, 8, 8, 32

    k1, k2, k3, k4 = jax.random.split(key, 4)
    output = jax.random.normal(k1, (B, T_out, H), dtype=jnp.float32)
    context = jax.random.normal(k2, (B, T_in, H), dtype=jnp.float32)
    # nn.Linear(dim*2, dim): weight (dim, 2*dim), bias (dim,)
    weight = jax.random.normal(k3, (H, 2 * H), dtype=jnp.float32) * 0.1
    bias = jax.random.normal(k4, (H,), dtype=jnp.float32) * 0.1

    # One-time parameter prep, hoisted out of the per-call path.
    params = prepare_nao_epd_attention_params(weight, bias)

    y, attn = nao_epd_attention(output, context, prepared_params=params)
    y = jax.block_until_ready(y)
    attn = jax.block_until_ready(attn)

    y_ref, attn_ref = _reference(output, context, weight, bias)
    # f32 path is exact up to MXU multi-pass f32 emulation / reduction order.
    assert jnp.allclose(y, y_ref, atol=1e-4, rtol=1e-4), \
        float(jnp.max(jnp.abs(y - y_ref)))
    assert jnp.allclose(attn, attn_ref, atol=1e-4, rtol=1e-4), \
        float(jnp.max(jnp.abs(attn - attn_ref)))

    print("KERNEL_OK")
</pallas_src>

<mosaic_0001>
module attributes {stable_mosaic.version = 11 : i64} {
  func.func @_nao_epd_attention_kernel(%arg0: i32, %arg1: i32, %arg2: memref<1x8x32xf32, #tpu.memory_space<vmem>>, %arg3: memref<1x8x32xf32, #tpu.memory_space<vmem>>, %arg4: memref<32x32xf32, #tpu.memory_space<vmem>>, %arg5: memref<32x32xf32, #tpu.memory_space<vmem>>, %arg6: memref<1x32xf32, #tpu.memory_space<vmem>>, %arg7: memref<1x8x32xf32, #tpu.memory_space<vmem>>, %arg8: memref<1x8x8xf32, #tpu.memory_space<vmem>>) attributes {dimension_semantics = [#tpu.dimension_semantics<parallel>, #tpu.dimension_semantics<arbitrary>], iteration_bounds = array<i64: 2, 1>, scalar_prefetch = 0 : i64, scratch_operands = 0 : i64, tpu.core_type = #tpu.core_type<tc>, window_params = [{transform_indices = @transform_0, window_bounds = array<i64: 1, 8, 32>}, {transform_indices = @transform_1, window_bounds = array<i64: 1, 8, 32>}, {pipeline_mode = #tpu.pipeline_mode<synchronous>, transform_indices = @transform_2, window_bounds = array<i64: 32, 32>}, {pipeline_mode = #tpu.pipeline_mode<synchronous>, transform_indices = @transform_3, window_bounds = array<i64: 32, 32>}, {pipeline_mode = #tpu.pipeline_mode<synchronous>, transform_indices = @transform_4, window_bounds = array<i64: 1, 32>}, {transform_indices = @transform_5, window_bounds = array<i64: 1, 8, 32>}, {transform_indices = @transform_6, window_bounds = array<i64: 1, 8, 8>}]} {
    %c0 = arith.constant 0 : index
    %c0_0 = arith.constant 0 : index
    %c0_1 = arith.constant 0 : index
    %0 = vector.load %arg2[%c0, %c0_0, %c0_1] : memref<1x8x32xf32, #tpu.memory_space<vmem>>, vector<1x8x32xf32>
    %1 = vector.shape_cast %0 : vector<1x8x32xf32> to vector<8x32xf32>
    %c0_2 = arith.constant 0 : index
    %c0_3 = arith.constant 0 : index
    %c0_4 = arith.constant 0 : index
    %2 = vector.load %arg3[%c0_2, %c0_3, %c0_4] : memref<1x8x32xf32, #tpu.memory_space<vmem>>, vector<1x8x32xf32>
    %3 = vector.shape_cast %2 : vector<1x8x32xf32> to vector<8x32xf32>
    %cst = arith.constant dense<0.000000e+00> : vector<8x8xf32>
    %4 = tpu.matmul %1, %3, %cst {dimension_numbers = #tpu.dot_dimension_numbers<[1], [1], [0], [0], [0, 0, 1, 0], [], []>} : vector<8x32xf32>, vector<8x32xf32>, vector<8x8xf32> -> vector<8x8xf32>
    %cst_5 = arith.constant dense<0xFF800000> : vector<8xf32>
    %5 = vector.multi_reduction <maximumf>, %4, %cst_5 [1] : vector<8x8xf32> to vector<8xf32>
    %6 = vector.shape_cast %5 : vector<8xf32> to vector<8x1xf32>
    %7 = vector.broadcast %6 : vector<8x1xf32> to vector<8x8xf32>
    %8 = arith.subf %4, %7 : vector<8x8xf32>
    %9 = math.exp %8 : vector<8x8xf32>
    %cst_6 = arith.constant dense<0.000000e+00> : vector<8xf32>
    %10 = vector.multi_reduction <add>, %9, %cst_6 [1] : vector<8x8xf32> to vector<8xf32>
    %11 = vector.shape_cast %10 : vector<8xf32> to vector<8x1xf32>
    %12 = vector.broadcast %11 : vector<8x1xf32> to vector<8x8xf32>
    %13 = arith.divf %9, %12 : vector<8x8xf32>
    %cst_7 = arith.constant dense<0.000000e+00> : vector<8x32xf32>
    %14 = tpu.matmul %13, %3, %cst_7 {dimension_numbers = #tpu.dot_dimension_numbers<[1], [0], [0], [1], [0, 0, 1, 1], [], []>} : vector<8x8xf32>, vector<8x32xf32>, vector<8x32xf32> -> vector<8x32xf32>
    %c0_8 = arith.constant 0 : index
    %c0_9 = arith.constant 0 : index
    %15 = vector.load %arg4[%c0_8, %c0_9] : memref<32x32xf32, #tpu.memory_space<vmem>>, vector<32x32xf32>
    %cst_10 = arith.constant dense<0.000000e+00> : vector<8x32xf32>
    %16 = tpu.matmul %14, %15, %cst_10 {dimension_numbers = #tpu.dot_dimension_numbers<[1], [0], [0], [1], [0, 0, 1, 1], [], []>} : vector<8x32xf32>, vector<32x32xf32>, vector<8x32xf32> -> vector<8x32xf32>
    %c0_11 = arith.constant 0 : index
    %c0_12 = arith.constant 0 : index
    %17 = vector.load %arg5[%c0_11, %c0_12] : memref<32x32xf32, #tpu.memory_space<vmem>>, vector<32x32xf32>
    %cst_13 = arith.constant dense<0.000000e+00> : vector<8x32xf32>
    %18 = tpu.matmul %1, %17, %cst_13 {dimension_numbers = #tpu.dot_dimension_numbers<[1], [0], [0], [1], [0, 0, 1, 1], [], []>} : vector<8x32xf32>, vector<32x32xf32>, vector<8x32xf32> -> vector<8x32xf32>
    %19 = arith.addf %16, %18 : vector<8x32xf32>
    %c0_14 = arith.constant 0 : index
    %c0_15 = arith.constant 0 : index
    %20 = vector.load %arg6[%c0_14, %c0_15] : memref<1x32xf32, #tpu.memory_space<vmem>>, vector<1x32xf32>
    %21 = vector.shape_cast %20 : vector<1x32xf32> to vector<32xf32>
    %22 = vector.shape_cast %21 : vector<32xf32> to vector<1x32xf32>
    %23 = vector.broadcast %22 : vector<1x32xf32> to vector<8x32xf32>
    %24 = arith.addf %19, %23 : vector<8x32xf32>
    %25 = math.tanh %24 : vector<8x32xf32>
    %c0_16 = arith.constant 0 : index
    %c0_17 = arith.constant 0 : index
    %c0_18 = arith.constant 0 : index
    %26 = vector.load %arg7[%c0_16, %c0_17, %c0_18] : memref<1x8x32xf32, #tpu.memory_space<vmem>>, vector<1x8x32xf32>
    %27 = vector.shape_cast %26 : vector<1x8x32xf32> to vector<8x32xf32>
    %28 = vector.shape_cast %25 : vector<8x32xf32> to vector<1x8x32xf32>
    tpu.vector_store %arg7[%c0_16, %c0_17, %c0_18], %28 {strides = array<i32>} : memref<1x8x32xf32, #tpu.memory_space<vmem>>, vector<1x8x32xf32>,
    %c0_19 = arith.constant 0 : index
    %c0_20 = arith.constant 0 : index
    %c0_21 = arith.constant 0 : index
    %29 = vector.load %arg8[%c0_19, %c0_20, %c0_21] : memref<1x8x8xf32, #tpu.memory_space<vmem>>, vector<1x8x8xf32>
    %30 = vector.shape_cast %29 : vector<1x8x8xf32> to vector<8x8xf32>
    %31 = vector.shape_cast %13 : vector<8x8xf32> to vector<1x8x8xf32>
    tpu.vector_store %arg8[%c0_19, %c0_20, %c0_21], %31 {strides = array<i32>} : memref<1x8x8xf32, #tpu.memory_space<vmem>>, vector<1x8x8xf32>,
    return
  }
  func.func @transform_0(%arg0: i32, %arg1: i32) -> (i32, i32, i32) {
    %c0_i32 = arith.constant 0 : i32
    %c0_i32_0 = arith.constant 0 : i32
    return %arg0, %arg1, %c0_i32 : i32, i32, i32
  }
  func.func @transform_1(%arg0: i32, %arg1: i32) -> (i32, i32, i32) {
    %c0_i32 = arith.constant 0 : i32
    %c0_i32_0 = arith.constant 0 : i32
    %c0_i32_1 = arith.constant 0 : i32
    return %arg0, %c0_i32, %c0_i32_0 : i32, i32, i32
  }
  func.func @transform_2(%arg0: i32, %arg1: i32) -> (i32, i32) {
    %c0_i32 = arith.constant 0 : i32
    %c0_i32_0 = arith.constant 0 : i32
    %c0_i32_1 = arith.constant 0 : i32
    return %c0_i32, %c0_i32_0 : i32, i32
  }
  func.func @transform_3(%arg0: i32, %arg1: i32) -> (i32, i32) {
    %c0_i32 = arith.constant 0 : i32
    %c0_i32_0 = arith.constant 0 : i32
    %c0_i32_1 = arith.constant 0 : i32
    return %c0_i32, %c0_i32_0 : i32, i32
  }
  func.func @transform_4(%arg0: i32, %arg1: i32) -> (i32, i32) {
    %c0_i32 = arith.constant 0 : i32
    %c0_i32_0 = arith.constant 0 : i32
    %c0_i32_1 = arith.constant 0 : i32
    return %c0_i32, %c0_i32_0 : i32, i32
  }
  func.func @transform_5(%arg0: i32, %arg1: i32) -> (i32, i32, i32) {
    %c0_i32 = arith.constant 0 : i32
    %c0_i32_0 = arith.constant 0 : i32
    return %arg0, %arg1, %c0_i32 : i32, i32, i32
  }
  func.func @transform_6(%arg0: i32, %arg1: i32) -> (i32, i32, i32) {
    %c0_i32 = arith.constant 0 : i32
    %c0_i32_0 = arith.constant 0 : i32
    return %arg0, %arg1, %c0_i32 : i32, i32, i32
  }
}

module attributes {stable_mosaic.version = 11 : i64} {
  func.func @_nao_epd_attention_kernel(%arg0: i32, %arg1: i32, %arg2: memref<1x8x32xf32, #tpu.memory_space<vmem>>, %arg3: memref<1x8x32xf32, #tpu.memory_space<vmem>>, %arg4: memref<32x32xf32, #tpu.memory_space<vmem>>, %arg5: memref<32x32xf32, #tpu.memory_space<vmem>>, %arg6: memref<1x32xf32, #tpu.memory_space<vmem>>, %arg7: memref<1x8x32xf32, #tpu.memory_space<vmem>>, %arg8: memref<1x8x8xf32, #tpu.memory_space<vmem>>) attributes {dimension_semantics = [#tpu.dimension_semantics<parallel>, #tpu.dimension_semantics<arbitrary>], iteration_bounds = array<i64: 2, 1>, scalar_prefetch = 0 : i64, scratch_operands = 0 : i64, tpu.core_type = #tpu.core_type<tc>, window_params = [{transform_indices = @transform_0, window_bounds = array<i64: 1, 8, 32>}, {transform_indices = @transform_1, window_bounds = array<i64: 1, 8, 32>}, {pipeline_mode = #tpu.pipeline_mode<synchronous>, transform_indices = @transform_2, window_bounds = array<i64: 32, 32>}, {pipeline_mode = #tpu.pipeline_mode<synchronous>, transform_indices = @transform_3, window_bounds = array<i64: 32, 32>}, {pipeline_mode = #tpu.pipeline_mode<synchronous>, transform_indices = @transform_4, window_bounds = array<i64: 1, 32>}, {transform_indices = @transform_5, window_bounds = array<i64: 1, 8, 32>}, {transform_indices = @transform_6, window_bounds = array<i64: 1, 8, 8>}]} {
    %c0 = arith.constant 0 : index
    %c0_0 = arith.constant 0 : index
    %c0_1 = arith.constant 0 : index
    %0 = vector.load %arg2[%c0, %c0_0, %c0_1] : memref<1x8x32xf32, #tpu.memory_space<vmem>>, vector<1x8x32xf32>
    %1 = vector.shape_cast %0 : vector<1x8x32xf32> to vector<8x32xf32>
    %c0_2 = arith.constant 0 : index
    %c0_3 = arith.constant 0 : index
    %c0_4 = arith.constant 0 : index
    %2 = vector.load %arg3[%c0_2, %c0_3, %c0_4] : memref<1x8x32xf32, #tpu.memory_space<vmem>>, vector<1x8x32xf32>
    %3 = vector.shape_cast %2 : vector<1x8x32xf32> to vector<8x32xf32>
    %cst = arith.constant dense<0.000000e+00> : vector<8x8xf32>
    %4 = tpu.matmul %1, %3, %cst {dimension_numbers = #tpu.dot_dimension_numbers<[1], [1], [0], [0], [0, 0, 1, 0], [], []>} : vector<8x32xf32>, vector<8x32xf32>, vector<8x8xf32> -> vector<8x8xf32>
    %cst_5 = arith.constant dense<0xFF800000> : vector<8xf32>
    %5 = vector.multi_reduction <maximumf>, %4, %cst_5 [1] : vector<8x8xf32> to vector<8xf32>
    %6 = vector.shape_cast %5 : vector<8xf32> to vector<8x1xf32>
    %7 = vector.broadcast %6 : vector<8x1xf32> to vector<8x8xf32>
    %8 = arith.subf %4, %7 : vector<8x8xf32>
    %9 = math.exp %8 : vector<8x8xf32>
    %cst_6 = arith.constant dense<0.000000e+00> : vector<8xf32>
    %10 = vector.multi_reduction <add>, %9, %cst_6 [1] : vector<8x8xf32> to vector<8xf32>
    %11 = vector.shape_cast %10 : vector<8xf32> to vector<8x1xf32>
    %12 = vector.broadcast %11 : vector<8x1xf32> to vector<8x8xf32>
    %13 = arith.divf %9, %12 : vector<8x8xf32>
    %cst_7 = arith.constant dense<0.000000e+00> : vector<8x32xf32>
    %14 = tpu.matmul %13, %3, %cst_7 {dimension_numbers = #tpu.dot_dimension_numbers<[1], [0], [0], [1], [0, 0, 1, 1], [], []>} : vector<8x8xf32>, vector<8x32xf32>, vector<8x32xf32> -> vector<8x32xf32>
    %c0_8 = arith.constant 0 : index
    %c0_9 = arith.constant 0 : index
    %15 = vector.load %arg4[%c0_8, %c0_9] : memref<32x32xf32, #tpu.memory_space<vmem>>, vector<32x32xf32>
    %cst_10 = arith.constant dense<0.000000e+00> : vector<8x32xf32>
    %16 = tpu.matmul %14, %15, %cst_10 {dimension_numbers = #tpu.dot_dimension_numbers<[1], [0], [0], [1], [0, 0, 1, 1], [], []>} : vector<8x32xf32>, vector<32x32xf32>, vector<8x32xf32> -> vector<8x32xf32>
    %c0_11 = arith.constant 0 : index
    %c0_12 = arith.constant 0 : index
    %17 = vector.load %arg5[%c0_11, %c0_12] : memref<32x32xf32, #tpu.memory_space<vmem>>, vector<32x32xf32>
    %cst_13 = arith.constant dense<0.000000e+00> : vector<8x32xf32>
    %18 = tpu.matmul %1, %17, %cst_13 {dimension_numbers = #tpu.dot_dimension_numbers<[1], [0], [0], [1], [0, 0, 1, 1], [], []>} : vector<8x32xf32>, vector<32x32xf32>, vector<8x32xf32> -> vector<8x32xf32>
    %19 = arith.addf %16, %18 : vector<8x32xf32>
    %c0_14 = arith.constant 0 : index
    %c0_15 = arith.constant 0 : index
    %20 = vector.load %arg6[%c0_14, %c0_15] : memref<1x32xf32, #tpu.memory_space<vmem>>, vector<1x32xf32>
    %21 = vector.shape_cast %20 : vector<1x32xf32> to vector<32xf32>
    %22 = vector.shape_cast %21 : vector<32xf32> to vector<1x32xf32>
    %23 = vector.broadcast %22 : vector<1x32xf32> to vector<8x32xf32>
    %24 = arith.addf %19, %23 : vector<8x32xf32>
    %25 = math.tanh %24 : vector<8x32xf32>
    %c0_16 = arith.constant 0 : index
    %c0_17 = arith.constant 0 : index
    %c0_18 = arith.constant 0 : index
    %26 = vector.load %arg7[%c0_16, %c0_17, %c0_18] : memref<1x8x32xf32, #tpu.memory_space<vmem>>, vector<1x8x32xf32>
    %27 = vector.shape_cast %26 : vector<1x8x32xf32> to vector<8x32xf32>
    %28 = vector.shape_cast %25 : vector<8x32xf32> to vector<1x8x32xf32>
    tpu.vector_store %arg7[%c0_16, %c0_17, %c0_18], %28 {strides = array<i32>} : memref<1x8x32xf32, #tpu.memory_space<vmem>>, vector<1x8x32xf32>,
    %c0_19 = arith.constant 0 : index
    %c0_20 = arith.constant 0 : index
    %c0_21 = arith.constant 0 : index
    %29 = vector.load %arg8[%c0_19, %c0_20, %c0_21] : memref<1x8x8xf32, #tpu.memory_space<vmem>>, vector<1x8x8xf32>
    %30 = vector.shape_cast %29 : vector<1x8x8xf32> to vector<8x8xf32>
    %31 = vector.shape_cast %13 : vector<8x8xf32> to vector<1x8x8xf32>
    tpu.vector_store %arg8[%c0_19, %c0_20, %c0_21], %31 {strides = array<i32>} : memref<1x8x8xf32, #tpu.memory_space<vmem>>, vector<1x8x8xf32>,
    return
  }
  func.func @transform_0(%arg0: i32, %arg1: i32) -> (i32, i32, i32) {
    %c0_i32 = arith.constant 0 : i32
    %c0_i32_0 = arith.constant 0 : i32
    return %arg0, %arg1, %c0_i32 : i32, i32, i32
  }
  func.func @transform_1(%arg0: i32, %arg1: i32) -> (i32, i32, i32) {
    %c0_i32 = arith.constant 0 : i32
    %c0_i32_0 = arith.constant 0 : i32
    %c0_i32_1 = arith.constant 0 : i32
    return %arg0, %c0_i32, %c0_i32_0 : i32, i32, i32
  }
  func.func @transform_2(%arg0: i32, %arg1: i32) -> (i32, i32) {
    %c0_i32 = arith.constant 0 : i32
    %c0_i32_0 = arith.constant 0 : i32
    %c0_i32_1 = arith.constant 0 : i32
    return %c0_i32, %c0_i32_0 : i32, i32
  }
  func.func @transform_3(%arg0: i32, %arg1: i32) -> (i32, i32) {
    %c0_i32 = arith.constant 0 : i32
    %c0_i32_0 = arith.constant 0 : i32
    %c0_i32_1 = arith.constant 0 : i32
    return %c0_i32, %c0_i32_0 : i32, i32
  }
  func.func @transform_4(%arg0: i32, %arg1: i32) -> (i32, i32) {
    %c0_i32 = arith.constant 0 : i32
    %c0_i32_0 = arith.constant 0 : i32
    %c0_i32_1 = arith.constant 0 : i32
    return %c0_i32, %c0_i32_0 : i32, i32
  }
  func.func @transform_5(%arg0: i32, %arg1: i32) -> (i32, i32, i32) {
    %c0_i32 = arith.constant 0 : i32
    %c0_i32_0 = arith.constant 0 : i32
    return %arg0, %arg1, %c0_i32 : i32, i32, i32
  }
  func.func @transform_6(%arg0: i32, %arg1: i32) -> (i32, i32, i32) {
    %c0_i32 = arith.constant 0 : i32
    %c0_i32_0 = arith.constant 0 : i32
    return %arg0, %arg1, %c0_i32 : i32, i32, i32
  }
}

</mosaic_0001>

<bundles_post_ra>
// kernel: tpu_custom_call.1
= control target key start
LH: loop header
LB: loop body
LE: loop exit
PB: predicated region body
PF: predicated region fallthrough
CT: control target
= control target key end

     0   :  { %s1575_s0 = inlined_call_operand.hbm [shape: f32[2,8,32], index: 0, kind: input, shape index: {}]   ;;  %s1576_s1 = inlined_call_operand.hbm [shape: f32[2,8,32], index: 1, kind: input, shape index: {}]   ;;  %s1577_s2 = inlined_call_operand.hbm [shape: f32[32,32], index: 2, kind: input, shape index: {}]   ;;  %s1578_s3 = inlined_call_operand.hbm [shape: f32[32,32], index: 3, kind: input, shape index: {}]   ;;  %s1579_s4 = inlined_call_operand.vmem [shape: f32[1,32], index: 4, kind: input, shape index: {}]   ;;  %s1580_s5 = inlined_call_operand.hbm [shape: f32[2,8,32], index: 5, kind: output, shape index: {0}]   ;;  %s1581_s6 = inlined_call_operand.hbm [shape: f32[2,8,8], index: 6, kind: output, shape index: {1}]  }
   0x1   :  { %1583 = sst [smem:[#allocation19_spill]] %s1575_s0 }
   0x2   :  { %1584 = sst [smem:[#allocation20_spill]] %s1576_s1 }
   0x3   :  { %1585 = sst [smem:[#allocation21_spill]] %s1577_s2 }
   0x4   :  { %1586 = sst [smem:[#allocation22_spill]] %s1578_s3 }
   0x5   :  { %12 = vsyncpa [#allocation3], 0 }
   0x6   :  { %14 = vsyncpa [#allocation3 + $0x1], 0 }
   0x7   :  { %15 = vsyncpa [#allocation6], 0 }
   0x8   :  { %17 = vsyncpa [#allocation6 + $0x1], 0 }
   0x9   :  { %18 = vsyncpa [#allocation9], 0 }
   0xa   :  { %19 = vsyncpa [#allocation4], 0 }
   0xb   :  { %21 = vsyncpa [#allocation4 + $0x1], 0 }
   0xc   :  { %22 = vsyncpa [#allocation12], 0 }
   0xd   :  { %24 = vsyncpa [#allocation12 + $0x1], 0  ;;  %s1333_s21 = smov 0   ;;  %s1335_s22 = smov 0  }
   0xe   :  { %s1337_s23 = smov 0   ;;  %s1339_s24 = smov 0  }
   0xf   :  { %s1341_s25 = smov 0   ;;  %s1343_s26 = smov 0  }
  0x10 LB: > { %s1364_s27 = sadd.s32 4294967295, %s1286_s26   ;;  %s879_s28 = sadd.s32 4294967294, %s1286_s26   ;;  %s1286_s26 = sphi %s1343_s26, %s30_s26   ;;  %s1282_s25 = sphi %s1341_s25, %s1608_s25   ;;  %s1278_s24 = sphi %s1339_s24, %s1607_s24   ;;  %s1274_s23 = sphi %s1337_s23, %s1606_s23   ;;  %s1270_s22 = sphi %s1335_s22, %s1605_s22   ;;  %s1266_s21 = sphi %s1333_s21, %s1604_s21  }
  0x11   : > { %p64_p0 = scmp.ne.s32.totalorder %s1270_s22, %s1266_s21  ;;  %p1582_p1 = scmp.eq.s32.totalorder %s1364_s27, 0 }
  0x12   : > { %p185_p3 = scmp.eq.s32.totalorder %s879_s28, 1  ;;  %p880_p5 = scmp.ge.s32.totalorder %s1286_s26, 1 }
  0x13   : > { %p1373_p4 = por %p1582_p1, %p64_p0  ;;  %p220_p7 = scmp.lt.s32.totalorder %s1286_s26, 3 }
  0x14   : > { %p1378_p6 = por %p185_p3, %p64_p0  ;;  %s1288_s8 = smov [#allocation7]  }
  0x15   : > { %p1383_p8 = pnand %p880_p5, %p220_p7  ;;  %s232_s9 = sshll.u32 %s1288_s8, 4  ;;  %s233_s9 = int_to_ptr.vmem [resolvable:$true] %s232_s9 }
  0x16   : > { %s1588_s30 = scalar_select %p1378_p6, 1, 0 }
  0x17   : > { %p969_p9 = pneg %p1383_p8  ;;  %s1289_s11 = smov [#allocation8]  }
  0x18   : > { %s245_s12 = sshll.u32 %s1289_s11, 4  ;;  %s1067_s13 = scalar_lea.vmem %s233_s9, 512  ;;  %s246_s12 = int_to_ptr.vmem [resolvable:$true] %s245_s12 }
  0x19   : > { %p1392_p11 = pnand %p969_p9, %p1582_p1  ;;  %p1068_p13 = scmp.ne.s32.totalorder %s233_s9, %s1067_s13 }
  0x1a   : > { %p1075_p5 = scmp.lt.s32.totalorder %s233_s9, %s233_s9  ;;  %p1076_p7 = scmp.lt.s32.totalorder %s1067_s13, %s1067_s13 }
  0x1b   : > { %p1058_p12 = pneg %p1392_p11 }
  0x1c   : > { %p1077_p10 = por %p1076_p7, %p1075_p5 }
  0x1d   : > { %p1070_p0 = pnand %p1068_p13, %p1058_p12 }
  0x1f   : > { %p1071_p3 = pneg %p1070_p0 }
  0x21   : > { %p1078_p9 = pnand %p1077_p10, %p1071_p3 }
  0x23   : > { %1081 = shalt.err (!%p1078_p9)
}
  0x24   : > { %s1290_s14 = smov 128   ;;  %s1291_s15 = smov 8  }
  0x25   : > { %s1591_s2 = sld [smem:[#allocation21_spill]]  ;;  %s1093_s18 = scalar_lea.vmem %s246_s12, 512 }
  0x26   : > { %p1094_p1 = scmp.ne.s32.totalorder %s246_s12, %s1093_s18  ;;  %p1101_p2 = scmp.lt.s32.totalorder %s246_s12, %s246_s12 }
  0x27   : > { %p1102_p6 = scmp.lt.s32.totalorder %s1093_s18, %s1093_s18 }
  0x28   : > { %p1096_p13 = pnand %p1094_p1, %p1058_p12 }
  0x29   : > { %p1103_p5 = por %p1102_p6, %p1101_p2 }
  0x2a   : > { %p1097_p0 = pneg %p1096_p13 }
  0x2b   : > { %972 = dma.hbm_to_vmem [thread:$0]  (!%p1392_p11), %s1591_s2, 512, %s233_s9, [#allocation6], %s1290_s14, %s1290_s14, %s1291_s15  }
  0x2c   : > { %p1104_p10 = pnand %p1103_p5, %p1097_p0 }
  0x2e   : > { %1107 = shalt.err (!%p1104_p10)
}
  0x2f   : > { %s1592_s3 = sld [smem:[#allocation22_spill]]  ;;  %s42_s28 = sadd.s32 1, %s1282_s25 }
  0x30   : > { %s51_s8 = sadd.s32 1, %s1274_s23  ;;  %p44_p1 = scmp.ge.s32.totalorder %s42_s28, 2 }
  0x31   : > { %p58_p2 = scmp.ne.s32.totalorder %s1274_s23, %s1270_s22  ;;  %p59_p6 = scmp.eq.s32.totalorder %s1286_s26, 0 }
  0x32   : > { %p992_p12 = scmp.lt.s32.totalorder %s1286_s26, 2  ;;  %s1610_s28 = smov (%p44_p1, %s42_s28), 0 }
  0x33   : > { %p60_p3 = por %p59_p6, %p58_p2  ;;  %p1593_p7 = scmp.eq.s32.totalorder %s1364_s27, 1 }
  0x34   : > { %s46_s10 = ssub.s32 %s1282_s25, %s1610_s28  ;;  %s262_s11 = sand.u32 1, %s1274_s23  }
  0x35   : > { %975 = dma.hbm_to_vmem [thread:$0]  (!%p1392_p11), %s1592_s3, 512, %s246_s12, [#allocation9], %s1290_s14, %s1290_s14, %s1291_s15  }
  0x36   : > { %p1424_p9 = por %p1593_p7, %p58_p2  ;;  %p49_p13 = scmp.eq.s32.totalorder %s46_s10, 0 }
  0x37   : > { %s884_s12 = sshll.u32 %s262_s11, 3  ;;  %s885_s13 = sshll.u32 %s1282_s25, 7 }
  0x38   : > { %s1433_s14 = scalar_select %p49_p13, %s1274_s23, %s51_s8  }
  0x39   : > { %s1595_s0 = sld [smem:[#allocation19_spill]]  ;;  %s266_s18 = scalar_lea.vmem [#allocation2], %s884_s12 }
  0x3a   : > { %s274_s19 = sshll.u32 %s266_s18, 4  ;;  %p1440_p11 = pnand %p992_p12, %p60_p3  ;;  %s275_s19 = int_to_ptr.vmem [resolvable:$true] %s274_s19 }
  0x3b   : > { %s1597_s1 = sld [smem:[#allocation20_spill]]  ;;  %s263_s8 = scalar_lea.sflag [#allocation3], %s262_s11 }
  0x3c   : > { %p1110_p0 = pneg %p1440_p11  ;;  %s1121_s15 = scalar_lea.vmem %s275_s19, 128 }
  0x3d   : > { %p1122_p5 = scmp.ne.s32.totalorder %s275_s19, %s1121_s15  ;;  %s1292_s16 = smov [#allocation2]  }
  0x3e   : > { %s1126_s18 = sshll.u32 %s1292_s16, 4  ;;  %s1127_s18 = int_to_ptr.vmem [resolvable:$false] %s1126_s18 }
  0x3f   : > { %s272_s17 = scalar_lea.hbm %s1595_s0, %s885_s13  ;;  %p1124_p10 = pnand %p1122_p5, %p1110_p0 }
  0x40   : > { %s1128_s0 = scalar_lea.vmem %s1127_s18, 256  ;;  %p1129_p2 = scmp.lt.s32.totalorder %s275_s19, %s1127_s18 }
  0x41   : > { %s1447_s3 = scalar_lea.hbm %s1597_s1, %s885_s13  ;;  %p1125_p1 = pneg %p1124_p10 }
  0x42   : > { %p1130_p6 = scmp.lt.s32.totalorder %s1128_s0, %s1121_s15 }
  0x44   : > { %p1131_p12 = por %p1130_p6, %p1129_p2 }
  0x46   : > { %p1132_p3 = pnand %p1131_p12, %p1125_p1 }
  0x48   : > { %1135 = shalt.err (!%p1132_p3)
}
  0x49   : > { %979 = dma.hbm_to_vmem [thread:$0]  (!%p1440_p11), %s272_s17, 128, %s275_s19, %s263_s8  }
  0x4a   : > { %s281_s2 = sand.u32 1, %s1286_s26   ;;  %s285_s11 = scalar_lea.vmem [#allocation5], %s884_s12 }
  0x4b   : > { %s292_s13 = sshll.u32 %s285_s11, 4  ;;  %s282_s10 = scalar_lea.sflag [#allocation6], %s281_s2  ;;  %s293_s13 = int_to_ptr.vmem [resolvable:$true] %s292_s13 }
  0x4c   : > { %s1149_s1 = scalar_lea.vmem %s293_s13, 128  ;;  %s1293_s0 = smov [#allocation5]  }
  0x4d   : > { %p1150_p7 = scmp.ne.s32.totalorder %s293_s13, %s1149_s1  ;;  %s1154_s15 = sshll.u32 %s1293_s0, 4  ;;  %s1155_s15 = int_to_ptr.vmem [resolvable:$false] %s1154_s15 }
  0x4e   : > { %s1156_s16 = scalar_lea.vmem %s1155_s15, 256  ;;  %p1157_p10 = scmp.lt.s32.totalorder %s293_s13, %s1155_s15 }
  0x4f   : > { %p1152_p13 = pnand %p1150_p7, %p1110_p0  ;;  %p1158_p1 = scmp.lt.s32.totalorder %s1156_s16, %s1149_s1 }
  0x51   : > { %p1153_p5 = pneg %p1152_p13  ;;  %p1159_p2 = por %p1158_p1, %p1157_p10 }
  0x53   : > { %p1160_p6 = pnand %p1159_p2, %p1153_p5 }
  0x55   : > { %1163 = shalt.err (!%p1160_p6)
}
  0x56   : > { %982 = dma.hbm_to_vmem [thread:$0]  (!%p1440_p11), %s1447_s3, 128, %s293_s13, %s282_s10  }
  0x57   : > { %301 = sbr.rel (%p1383_p8) target bundleno = 1030 (0x406), region = 40  ;;  %s1466_s12 = sand.u32 (!%p1383_p8), 1, %s1270_s22  }
  0x58   : > { %s1469_s17 = sshll.u32 (!%p1383_p8), %s1466_s12, 3  ;;  %s304_s1 = scalar_lea.sflag (!%p1383_p8), [#allocation3], %s1466_s12 }
  0x59   : > { %s307_s19 = scalar_lea.vmem (!%p1383_p8), [#allocation2], %s1469_s17 }
  0x5c   : > { %1241 = dma.done.wait (%p1373_p4), %s304_s1, 128  }
  0x5d   : > { %1243 = vsyncadd (%p1373_p4), %s304_s1, 4294967168  ;;  %s312_s3 = sand.u32 1, %s1364_s27   ;;  %s316_s20 = scalar_lea.vmem [#allocation5], %s1469_s17 }
  0x5e   : > { %s313_s7 = scalar_lea.sflag [#allocation6], %s312_s3 }
  0x5f   : > { %1245 = dma.done.wait (%p1373_p4), %s313_s7, 128  }
  0x60   : > { %1247 = vsyncadd (%p1373_p4), %s313_s7, 4294967168  ;;  %p1598_p8 = scmp.eq.s32.totalorder %s1364_s27, 0 }
  0x62   : > { %1249 = dma.done.wait (%p1598_p8), [#allocation6], 512   ;;  %p1599_p11 = pmov %p1598_p8 }
  0x63   : > { %p1600_p0 = pmov %p1598_p8 }
  0x64   : > { %1251 = vsyncadd (%p1599_p11), [#allocation6], 4294966784 }
  0x65   : > { %1253 = dma.done.wait (%p1600_p0), [#allocation9], 512   ;;  %p1601_p12 = pmov %p1600_p0 }
  0x66   : > { %v1294_v0 = vmov 0.0   ;;  %vm1295_vm0 = vmmov 0   ;;  %vm365_vm1 = vcmask 261120   ;;  %v364_v1 = vld [vmem:[%s316_s20] sm:$0xff]  ;;  %v363_v2 = vld [vmem:[%s307_s19] sm:$0xff]  ;;  %vm442_vm2 = vcmask 64512  }
  0x67   : > { %1255 = vsyncadd (%p1601_p12), [#allocation9], 4294966784  ;;  %921 = vmatprep.subr.mxu0 %v1294_v0  ;;  %923 = vmatprep.mubr.msk.f32.mxu0 %vm1295_vm0, %v1294_v0  ;;  %v530_v11 = vld [vmem:[#allocation7 + $0x18] sm:$0xff]  ;;  %v529_v12 = vld [vmem:[#allocation7 + $0x10] sm:$0xff]  ;;  %s362_s27 = scalar_lea.vmem [#allocation11], %s1469_s17  ;;  %s903_s29 = sshll.u32 %s1278_s24, 7 }
  0x68   : > { %926 = vmatprep.subr.mxu1 %v1294_v0  ;;  %928 = vmatprep.mubr.msk.f32.mxu1 %vm1295_vm0, %v1294_v0  ;;  %v528_v13 = vld [vmem:[#allocation7 + $0x8] sm:$0xff]  ;;  %v534_v17 = vld [vmem:[#allocation8 + $0x18] sm:$0xff]  ;;  %v533_v18 = vld [vmem:[#allocation8 + $0x10] sm:$0xff]  ;;  %s721_s2 = scalar_lea.hbm %s1581_s6, %s903_s29  ;;  %s723_s11 = sshll.u32 %s362_s27, 4  ;;  %s724_s11 = int_to_ptr.vmem [resolvable:$true] %s723_s11 }
  0x69   : > { %922 = vmatpush3.xpose.msk.msra.mxu0 %vm365_vm1, %v364_v1  ;;  %927 = vmatpush3.msra.mxu1 %v364_v1  ;;  %v532_v19 = vld [vmem:[#allocation8 + $0x8] sm:$0xff]  ;;  %v531_v20 = vld [vmem:[#allocation8] sm:$0xff]  ;;  %s695_s13 = scalar_lea.sflag [#allocation12], %s1466_s12  ;;  %s1164_s10 = scalar_lea.vmem %s724_s11, 128 }
  0x6a   : > { %931 = vmatprep.subr.mxu1 %v1294_v0  ;;  %942 = vmatprep.subr.mxu0 %v1294_v0  ;;  %v527_v21 = vld [vmem:[#allocation7] sm:$0xff]  ;;  %p1165_p4 = scmp.ne.s32.totalorder %s724_s11, %s1164_s10  ;;  %s1296_s0 = smov [#allocation11]  }
  0x6b   : > { %s1168_s15 = sshll.u32 %s1296_s0, 4  ;;  %s1169_s15 = int_to_ptr.vmem [resolvable:$false] %s1168_s15 }
  0x6c   : > { %924 = vmatmul.mubr.msk.f32.vlgmr.msra.gmra.mxu0 %vm365_vm1, %v363_v2  ;;  %p1166_p3 = pnand %p1165_p4, %p1424_p9  ;;  %s1170_s16 = scalar_lea.vmem %s1169_s15, 256 }
  0x6d   : > { %950 = vmatprep.mubr.msk.f32.mxu0 %vm1295_vm0, %v1294_v0  ;;  %943 = vmatpush3.msra.mxu0 %v530_v11  ;;  %p1171_p13 = scmp.lt.s32.totalorder %s724_s11, %s1169_s15  ;;  %p1172_p5 = scmp.lt.s32.totalorder %s1170_s16, %s1164_s10 }
  0x6e   : > { %944 = vmatprep.subr.mxu0 %v1294_v0  ;;  %p1167_p7 = pneg %p1166_p3 }
  0x6f   : > { %945 = vmatpush3.msra.mxu0 %v529_v12  ;;  %p1173_p10 = por %p1172_p5, %p1171_p13 }
  0x70   : > { %946 = vmatprep.subr.mxu0 %v1294_v0 }
  0x71   : > { %947 = vmatpush3.msra.mxu0 %v528_v13  ;;  %p1174_p1 = pnand %p1173_p10, %p1167_p7 }
  0x72   : > { %948 = vmatprep.subr.mxu0 %v1294_v0 }
  0x73   : > { %949 = vmatpush3.msra.mxu0 %v527_v21 }
 0x12c   : > { %v438_v3 = vpop.f32.mrf.mxu0 }
 0x12d   : > { %v443_v4 = vsel %vm442_vm2, %v438_v3, -inf }
 0x12e   : > { %444 = vmax.xlane.f32.xlu0 %v443_v4  ;;  %v925_v5 = vpop.f32.mrf.mxu0 }
 0x1b7   : > { %v445_v6 = vpop.xlane.xlu0 %444 }
 0x1b8   : > { %v446_v7 = vsub.f32 %v438_v3, %v445_v6 }
 0x1ba   : > { %v447_v8 = vmul.f32 1.442695, %v446_v7 }
 0x1bc   : > { %1050 = vpow2.f32 %v447_v8 }
 0x1c9   : > { %v1051_v9 = vpop.eup %1050 }
 0x1ca   : > { %v449_v10 = vsel %vm442_vm2, %v1051_v9, 0.0 }
 0x1cb   : > { %450 = vadd.xlane.f32.xlu0 %v449_v10 }
 0x254   : > { %v451_v14 = vpop.xlane.xlu0 %450 }
 0x255   : > { %1052 = vrcp.f32 %v451_v14 }
 0x262   : > { %v1053_v15 = vpop.eup %1052 }
 0x263   : > { %v453_v16 = vmul.f32 %v1053_v15, %v1051_v9 }
 0x265   : > { %929 = vmatmul.mubr.msk.f32.vlgmr.msra.gmra.mxu1 %vm442_vm2, %v453_v16  ;;  %688 = vst.msk [vmem:[%s362_s27] sm:$0xff] %vm442_vm2, %v453_v16 }
 0x266   : > { %932 = vmatpush3.msra.mxu1 %v534_v17  ;;  %939 = vmatprep.mubr.msk.f32.mxu1 %vm1295_vm0, %v1294_v0 }
 0x267   : > { %933 = vmatprep.subr.mxu1 %v1294_v0 }
 0x268   : > { %934 = vmatpush3.msra.mxu1 %v533_v18 }
 0x269   : > { %935 = vmatprep.subr.mxu1 %v1294_v0 }
 0x26a   : > { %936 = vmatpush3.msra.mxu1 %v532_v19 }
 0x26b   : > { %937 = vmatprep.subr.mxu1 %v1294_v0 }
 0x26c   : > { %938 = vmatpush3.msra.mxu1 %v531_v20 }
 0x26d   : > { %940 = vmatmul.mubr.msk.f32.vlgmr.msra.gmra.mxu1 %vm365_vm1, %v363_v2 }
 0x325   : > { %v523_v22 = vpop.f32.mrf.mxu1 }
 0x326   : > { %951 = vmatmul.mubr.msk.f32.vlgmr.msra.gmra.mxu0 %vm365_vm1, %v523_v22 }
 0x327   : > { %v930_v23 = vpop.f32.mrf.mxu1 }
 0x32d   : > { %v601_v24 = vpop.f32.mrf.mxu1 }
 0x32f   : > { %v941_v25 = vpop.f32.mrf.mxu1 }
 0x330   : > { %1177 = shalt.err (!%p1174_p1)
}
 0x331   : > { %s1178_s1 = scalar_lea.hbm %s721_s2, 128  ;;  %s1182_s7 = scalar_lea.hbm %s1581_s6, 256 }
 0x332   : > { %p1179_p2 = scmp.ne.s32.totalorder %s721_s2, %s1178_s1  ;;  %p1183_p11 = scmp.lt.s32.totalorder %s721_s2, %s1581_s6 }
 0x333   : > { %p1184_p0 = scmp.lt.s32.totalorder %s1182_s7, %s1178_s1 }
 0x334   : > { %p1180_p6 = pnand %p1179_p2, %p1424_p9 }
 0x335   : > { %p1185_p12 = por %p1184_p0, %p1183_p11 }
 0x336   : > { %p1181_p8 = pneg %p1180_p6 }
 0x338   : > { %p1186_p4 = pnand %p1185_p12, %p1181_p8 }
 0x33a   : > { %1189 = shalt.err (!%p1186_p4)
}
 0x33b   : > { %966 = dma.vmem_to_hbm [thread:$0]  (%p1424_p9), %s724_s11, 128, %s721_s2, %s695_s13   ;;  %v900_v27 = vld [vmem:[%s1579_s4] ss:$0 sm:$0xff] }
 0x33c   : > { %s355_s10 = scalar_lea.vmem [#allocation10], %s1469_s17  ;;  %s1532_s1 = scalar_lea.hbm %s1580_s5, %s903_s29 }
 0x33d   : > { %s709_s0 = sshll.u32 %s355_s10, 4  ;;  %s690_s2 = scalar_lea.sflag [#allocation4], %s1466_s12  ;;  %s710_s0 = int_to_ptr.vmem [resolvable:$true] %s709_s0 }
 0x33e   : > { %s1190_s11 = scalar_lea.vmem %s710_s0, 128  ;;  %s1297_s13 = smov [#allocation10]  }
 0x33f   : > { %p1191_p3 = scmp.ne.s32.totalorder %s710_s0, %s1190_s11  ;;  %s1194_s19 = sshll.u32 %s1297_s13, 4  ;;  %s1195_s19 = int_to_ptr.vmem [resolvable:$false] %s1194_s19 }
 0x340   : > { %s1196_s17 = scalar_lea.vmem %s1195_s19, 256  ;;  %p1197_p5 = scmp.lt.s32.totalorder %s710_s0, %s1195_s19 }
 0x341   : > { %p1192_p7 = pnand %p1191_p3, %p1424_p9  ;;  %p1198_p10 = scmp.lt.s32.totalorder %s1196_s17, %s1190_s11 }
 0x343   : > { %p1193_p13 = pneg %p1192_p7  ;;  %p1199_p1 = por %p1198_p10, %p1197_p5 }
 0x345   : > { %p1200_p2 = pnand %p1199_p1, %p1193_p13 }
 0x3e6   : > { %v674_v26 = vpop.f32.mrf.mxu0 }
 0x3e7   : > { %v675_v28 = vadd.f32 %v674_v26, %v601_v24 }
 0x3e8   : > { %v952_v29 = vpop.f32.mrf.mxu0 }
 0x3e9   : > { %v685_v30 = vadd.f32 %v900_v27, %v675_v28 }
 0x3eb   : > { %1054 = vtanh.f32 %v685_v30 }
 0x3f8   : > { %v1055_v31 = vpop.eup %1054 }
 0x3f9   : > { %687 = vst.msk [vmem:[%s355_s10] sm:$0xff] %vm365_vm1, %v1055_v31 }
 0x3fa   : > { %1203 = shalt.err (!%p1200_p2)
}
 0x3fb   : > { %s1204_s24 = scalar_lea.hbm %s1532_s1, 128  ;;  %s1208_s3 = scalar_lea.hbm %s1580_s5, 256 }
 0x3fc   : > { %p1205_p6 = scmp.ne.s32.totalorder %s1532_s1, %s1204_s24  ;;  %p1209_p0 = scmp.lt.s32.totalorder %s1532_s1, %s1580_s5 }
 0x3fd   : > { %p1210_p12 = scmp.lt.s32.totalorder %s1208_s3, %s1204_s24 }
 0x3fe   : > { %p1206_p8 = pnand %p1205_p6, %p1424_p9 }
 0x3ff   : > { %p1211_p4 = por %p1210_p12, %p1209_p0 }
 0x400   : > { %p1207_p11 = pneg %p1206_p8 }
 0x402   : > { %p1212_p3 = pnand %p1211_p4, %p1207_p11 }
 0x404   : > { %1215 = shalt.err (!%p1212_p3)
}
 0x405   : > { %965 = dma.vmem_to_hbm [thread:$0]  (%p1424_p9), %s710_s0, 128, %s1532_s1, %s690_s2  }
 0x406 PF: > { %s735_s27 = sand.u32 1, %s1266_s21   ;;  %p1602_p7 = scmp.ne.s32.totalorder %s1588_s30, 0 }
 0x407   : > { %p1603_p13 = scmp.ge.s32.totalorder %s1286_s26, 2  ;;  %s736_s8 = scalar_lea.sflag [#allocation4], %s735_s27 }
 0x409   : > { %p984_p5 = pnand %p1603_p13, %p1602_p7 }
 0x40b   : > { %p985_p10 = pneg %p984_p5 }
 0x40d   : > { %1257 = dma.done.wait (%p985_p10), %s736_s8, 128  }
 0x40e   : > { %1259 = vsyncadd (%p985_p10), %s736_s8, 4294967168  ;;  %s745_s18 = scalar_lea.sflag [#allocation12], %s735_s27 }
 0x40f   : > { %1261 = dma.done.wait (%p985_p10), %s745_s18, 128  }
 0x410   : > { %1263 = vsyncadd (%p985_p10), %s745_s18, 4294967168  ;;  %s30_s26 = sadd.s32 1, %s1286_s26   ;;  %s1604_s21 = smov %s1270_s22 }
 0x411   : > { %p27_p1 = scmp.ge.s32.totalorder %s30_s26, 4   ;;  %s1605_s22 = smov %s1274_s23 }
 0x412   : > { %s1606_s23 = smov %s1433_s14  ;;  %s1607_s24 = smov %s1282_s25 }
 0x413   : > { %s1608_s25 = smov %s1610_s28  ;;  %29 = sbr.rel (!%p27_p1) target bundleno = 16 (0x10), region = 123 }
 0x418   :  { %750 = vsyncpa [#allocation3], 1 }
 0x419   :  { %752 = vsyncpa [#allocation3 + $0x1], 1 }
 0x41a   :  { %753 = vsyncpa [#allocation6], 1 }
 0x41b   :  { %755 = vsyncpa [#allocation6 + $0x1], 1 }
 0x41c   :  { %756 = vsyncpa [#allocation9], 1 }
 0x41d   :  { %757 = vsyncpa [#allocation4], 1 }
 0x41e   :  { %759 = vsyncpa [#allocation4 + $0x1], 1 }
 0x41f   :  { %760 = vsyncpa [#allocation12], 1 }
 0x420   :  { %762 = vsyncpa [#allocation12 + $0x1], 1 }

// kernel: tpu_custom_call.1
= control target key start
LH: loop header
LB: loop body
LE: loop exit
PB: predicated region body
PF: predicated region fallthrough
CT: control target
= control target key end

     0   :  { %s1575_s0 = inlined_call_operand.hbm [shape: f32[2,8,32], index: 0, kind: input, shape index: {}]   ;;  %s1576_s1 = inlined_call_operand.hbm [shape: f32[2,8,32], index: 1, kind: input, shape index: {}]   ;;  %s1577_s2 = inlined_call_operand.hbm [shape: f32[32,32], index: 2, kind: input, shape index: {}]   ;;  %s1578_s3 = inlined_call_operand.hbm [shape: f32[32,32], index: 3, kind: input, shape index: {}]   ;;  %s1579_s4 = inlined_call_operand.vmem [shape: f32[1,32], index: 4, kind: input, shape index: {}]   ;;  %s1580_s5 = inlined_call_operand.hbm [shape: f32[2,8,32], index: 5, kind: output, shape index: {0}]   ;;  %s1581_s6 = inlined_call_operand.hbm [shape: f32[2,8,8], index: 6, kind: output, shape index: {1}]  }
   0x1   :  { %1583 = sst [smem:[#allocation19_spill]] %s1575_s0 }
   0x2   :  { %1584 = sst [smem:[#allocation20_spill]] %s1576_s1 }
   0x3   :  { %1585 = sst [smem:[#allocation21_spill]] %s1577_s2 }
   0x4   :  { %1586 = sst [smem:[#allocation22_spill]] %s1578_s3 }
   0x5   :  { %12 = vsyncpa [#allocation3], 0 }
   0x6   :  { %14 = vsyncpa [#allocation3 + $0x1], 0 }
   0x7   :  { %15 = vsyncpa [#allocation6], 0 }
   0x8   :  { %17 = vsyncpa [#allocation6 + $0x1], 0 }
   0x9   :  { %18 = vsyncpa [#allocation9], 0 }
   0xa   :  { %19 = vsyncpa [#allocation4], 0 }
   0xb   :  { %21 = vsyncpa [#allocation4 + $0x1], 0 }
   0xc   :  { %22 = vsyncpa [#allocation12], 0 }
   0xd   :  { %24 = vsyncpa [#allocation12 + $0x1], 0  ;;  %s1333_s21 = smov 0   ;;  %s1335_s22 = smov 0  }
   0xe   :  { %s1337_s23 = smov 0   ;;  %s1339_s24 = smov 0  }
   0xf   :  { %s1341_s25 = smov 0   ;;  %s1343_s26 = smov 0  }
  0x10 LB: > { %s1364_s27 = sadd.s32 4294967295, %s1286_s26   ;;  %s879_s28 = sadd.s32 4294967294, %s1286_s26   ;;  %s1286_s26 = sphi %s1343_s26, %s30_s26   ;;  %s1282_s25 = sphi %s1341_s25, %s1608_s25   ;;  %s1278_s24 = sphi %s1339_s24, %s1607_s24   ;;  %s1274_s23 = sphi %s1337_s23, %s1606_s23   ;;  %s1270_s22 = sphi %s1335_s22, %s1605_s22   ;;  %s1266_s21 = sphi %s1333_s21, %s1604_s21  }
  0x11   : > { %p64_p0 = scmp.ne.s32.totalorder %s1270_s22, %s1266_s21  ;;  %p1582_p1 = scmp.eq.s32.totalorder %s1364_s27, 0 }
  0x12   : > { %p185_p3 = scmp.eq.s32.totalorder %s879_s28, 1  ;;  %p880_p5 = scmp.ge.s32.totalorder %s1286_s26, 1 }
  0x13   : > { %p1373_p4 = por %p1582_p1, %p64_p0  ;;  %p220_p7 = scmp.lt.s32.totalorder %s1286_s26, 3 }
  0x14   : > { %p1378_p6 = por %p185_p3, %p64_p0  ;;  %s1288_s8 = smov [#allocation7]  }
  0x15   : > { %p1383_p8 = pnand %p880_p5, %p220_p7  ;;  %s232_s9 = sshll.u32 %s1288_s8, 4  ;;  %s233_s9 = int_to_ptr.vmem [resolvable:$true] %s232_s9 }
  0x16   : > { %s1588_s30 = scalar_select %p1378_p6, 1, 0 }
  0x17   : > { %p969_p9 = pneg %p1383_p8  ;;  %s1289_s11 = smov [#allocation8]  }
  0x18   : > { %s245_s12 = sshll.u32 %s1289_s11, 4  ;;  %s1067_s13 = scalar_lea.vmem %s233_s9, 512  ;;  %s246_s12 = int_to_ptr.vmem [resolvable:$true] %s245_s12 }
  0x19   : > { %p1392_p11 = pnand %p969_p9, %p1582_p1  ;;  %p1068_p13 = scmp.ne.s32.totalorder %s233_s9, %s1067_s13 }
  0x1a   : > { %p1075_p5 = scmp.lt.s32.totalorder %s233_s9, %s233_s9  ;;  %p1076_p7 = scmp.lt.s32.totalorder %s1067_s13, %s1067_s13 }
  0x1b   : > { %p1058_p12 = pneg %p1392_p11 }
  0x1c   : > { %p1077_p10 = por %p1076_p7, %p1075_p5 }
  0x1d   : > { %p1070_p0 = pnand %p1068_p13, %p1058_p12 }
  0x1f   : > { %p1071_p3 = pneg %p1070_p0 }
  0x21   : > { %p1078_p9 = pnand %p1077_p10, %p1071_p3 }
  0x23   : > { %1081 = shalt.err (!%p1078_p9)
}
  0x24   : > { %s1290_s14 = smov 128   ;;  %s1291_s15 = smov 8  }
  0x25   : > { %s1591_s2 = sld [smem:[#allocation21_spill]]  ;;  %s1093_s18 = scalar_lea.vmem %s246_s12, 512 }
  0x26   : > { %p1094_p1 = scmp.ne.s32.totalorder %s246_s12, %s1093_s18  ;;  %p1101_p2 = scmp.lt.s32.totalorder %s246_s12, %s246_s12 }
  0x27   : > { %p1102_p6 = scmp.lt.s32.totalorder %s1093_s18, %s1093_s18 }
  0x28   : > { %p1096_p13 = pnand %p1094_p1, %p1058_p12 }
  0x29   : > { %p1103_p5 = por %p1102_p6, %p1101_p2 }
  0x2a   : > { %p1097_p0 = pneg %p1096_p13 }
  0x2b   : > { %972 = dma.hbm_to_vmem [thread:$0]  (!%p1392_p11), %s1591_s2, 512, %s233_s9, [#allocation6], %s1290_s14, %s1290_s14, %s1291_s15  }
  0x2c   : > { %p1104_p10 = pnand %p1103_p5, %p1097_p0 }
  0x2e   : > { %1107 = shalt.err (!%p1104_p10)
}
  0x2f   : > { %s1592_s3 = sld [smem:[#allocation22_spill]]  ;;  %s42_s28 = sadd.s32 1, %s1282_s25 }
  0x30   : > { %s51_s8 = sadd.s32 1, %s1274_s23  ;;  %p44_p1 = scmp.ge.s32.totalorder %s42_s28, 2 }
  0x31   : > { %p58_p2 = scmp.ne.s32.totalorder %s1274_s23, %s1270_s22  ;;  %p59_p6 = scmp.eq.s32.totalorder %s1286_s26, 0 }
  0x32   : > { %p992_p12 = scmp.lt.s32.totalorder %s1286_s26, 2  ;;  %s1610_s28 = smov (%p44_p1, %s42_s28), 0 }
  0x33   : > { %p60_p3 = por %p59_p6, %p58_p2  ;;  %p1593_p7 = scmp.eq.s32.totalorder %s1364_s27, 1 }
  0x34   : > { %s46_s10 = ssub.s32 %s1282_s25, %s1610_s28  ;;  %s262_s11 = sand.u32 1, %s1274_s23  }
  0x35   : > { %975 = dma.hbm_to_vmem [thread:$0]  (!%p1392_p11), %s1592_s3, 512, %s246_s12, [#allocation9], %s1290_s14, %s1290_s14, %s1291_s15  }
  0x36   : > { %p1424_p9 = por %p1593_p7, %p58_p2  ;;  %p49_p13 = scmp.eq.s32.totalorder %s46_s10, 0 }
  0x37   : > { %s884_s12 = sshll.u32 %s262_s11, 3  ;;  %s885_s13 = sshll.u32 %s1282_s25, 7 }
  0x38   : > { %s1433_s14 = scalar_select %p49_p13, %s1274_s23, %s51_s8  }
  0x39   : > { %s1595_s0 = sld [smem:[#allocation19_spill]]  ;;  %s266_s18 = scalar_lea.vmem [#allocation2], %s884_s12 }
  0x3a   : > { %s274_s19 = sshll.u32 %s266_s18, 4  ;;  %p1440_p11 = pnand %p992_p12, %p60_p3  ;;  %s275_s19 = int_to_ptr.vmem [resolvable:$true] %s274_s19 }
  0x3b   : > { %s1597_s1 = sld [smem:[#allocation20_spill]]  ;;  %s263_s8 = scalar_lea.sflag [#allocation3], %s262_s11 }
  0x3c   : > { %p1110_p0 = pneg %p1440_p11  ;;  %s1121_s15 = scalar_lea.vmem %s275_s19, 128 }
  0x3d   : > { %p1122_p5 = scmp.ne.s32.totalorder %s275_s19, %s1121_s15  ;;  %s1292_s16 = smov [#allocation2]  }
  0x3e   : > { %s1126_s18 = sshll.u32 %s1292_s16, 4  ;;  %s1127_s18 = int_to_ptr.vmem [resolvable:$false] %s1126_s18 }
  0x3f   : > { %s272_s17 = scalar_lea.hbm %s1595_s0, %s885_s13  ;;  %p1124_p10 = pnand %p1122_p5, %p1110_p0 }
  0x40   : > { %s1128_s0 = scalar_lea.vmem %s1127_s18, 256  ;;  %p1129_p2 = scmp.lt.s32.totalorder %s275_s19, %s1127_s18 }
  0x41   : > { %s1447_s3 = scalar_lea.hbm %s1597_s1, %s885_s13  ;;  %p1125_p1 = pneg %p1124_p10 }
  0x42   : > { %p1130_p6 = scmp.lt.s32.totalorder %s1128_s0, %s1121_s15 }
  0x44   : > { %p1131_p12 = por %p1130_p6, %p1129_p2 }
  0x46   : > { %p1132_p3 = pnand %p1131_p12, %p1125_p1 }
  0x48   : > { %1135 = shalt.err (!%p1132_p3)
}
  0x49   : > { %979 = dma.hbm_to_vmem [thread:$0]  (!%p1440_p11), %s272_s17, 128, %s275_s19, %s263_s8  }
  0x4a   : > { %s281_s2 = sand.u32 1, %s1286_s26   ;;  %s285_s11 = scalar_lea.vmem [#allocation5], %s884_s12 }
  0x4b   : > { %s292_s13 = sshll.u32 %s285_s11, 4  ;;  %s282_s10 = scalar_lea.sflag [#allocation6], %s281_s2  ;;  %s293_s13 = int_to_ptr.vmem [resolvable:$true] %s292_s13 }
  0x4c   : > { %s1149_s1 = scalar_lea.vmem %s293_s13, 128  ;;  %s1293_s0 = smov [#allocation5]  }
  0x4d   : > { %p1150_p7 = scmp.ne.s32.totalorder %s293_s13, %s1149_s1  ;;  %s1154_s15 = sshll.u32 %s1293_s0, 4  ;;  %s1155_s15 = int_to_ptr.vmem [resolvable:$false] %s1154_s15 }
  0x4e   : > { %s1156_s16 = scalar_lea.vmem %s1155_s15, 256  ;;  %p1157_p10 = scmp.lt.s32.totalorder %s293_s13, %s1155_s15 }
  0x4f   : > { %p1152_p13 = pnand %p1150_p7, %p1110_p0  ;;  %p1158_p1 = scmp.lt.s32.totalorder %s1156_s16, %s1149_s1 }
  0x51   : > { %p1153_p5 = pneg %p1152_p13  ;;  %p1159_p2 = por %p1158_p1, %p1157_p10 }
  0x53   : > { %p1160_p6 = pnand %p1159_p2, %p1153_p5 }
  0x55   : > { %1163 = shalt.err (!%p1160_p6)
}
  0x56   : > { %982 = dma.hbm_to_vmem [thread:$0]  (!%p1440_p11), %s1447_s3, 128, %s293_s13, %s282_s10  }
  0x57   : > { %301 = sbr.rel (%p1383_p8) target bundleno = 1030 (0x406), region = 40  ;;  %s1466_s12 = sand.u32 (!%p1383_p8), 1, %s1270_s22  }
  0x58   : > { %s1469_s17 = sshll.u32 (!%p1383_p8), %s1466_s12, 3  ;;  %s304_s1 = scalar_lea.sflag (!%p1383_p8), [#allocation3], %s1466_s12 }
  0x59   : > { %s307_s19 = scalar_lea.vmem (!%p1383_p8), [#allocation2], %s1469_s17 }
  0x5c   : > { %1241 = dma.done.wait (%p1373_p4), %s304_s1, 128  }
  0x5d   : > { %1243 = vsyncadd (%p1373_p4), %s304_s1, 4294967168  ;;  %s312_s3 = sand.u32 1, %s1364_s27   ;;  %s316_s20 = scalar_lea.vmem [#allocation5], %s1469_s17 }
  0x5e   : > { %s313_s7 = scalar_lea.sflag [#allocation6], %s312_s3 }
  0x5f   : > { %1245 = dma.done.wait (%p1373_p4), %s313_s7, 128  }
  0x60   : > { %1247 = vsyncadd (%p1373_p4), %s313_s7, 4294967168  ;;  %p1598_p8 = scmp.eq.s32.totalorder %s1364_s27, 0 }
  0x62   : > { %1249 = dma.done.wait (%p1598_p8), [#allocation6], 512   ;;  %p1599_p11 = pmov %p1598_p8 }
  0x63   : > { %p1600_p0 = pmov %p1598_p8 }
  0x64   : > { %1251 = vsyncadd (%p1599_p11), [#allocation6], 4294966784 }
  0x65   : > { %1253 = dma.done.wait (%p1600_p0), [#allocation9], 512   ;;  %p1601_p12 = pmov %p1600_p0 }
  0x66   : > { %v1294_v0 = vmov 0.0   ;;  %vm1295_vm0 = vmmov 0   ;;  %vm365_vm1 = vcmask 261120   ;;  %v364_v1 = vld [vmem:[%s316_s20] sm:$0xff]  ;;  %v363_v2 = vld [vmem:[%s307_s19] sm:$0xff]  ;;  %vm442_vm2 = vcmask 64512  }
  0x67   : > { %1255 = vsyncadd (%p1601_p12), [#allocation9], 4294966784  ;;  %921 = vmatprep.subr.mxu0 %v1294_v0  ;;  %923 = vmatprep.mubr.msk.f32.mxu0 %vm1295_vm0, %v1294_v0  ;;  %v530_v11 = vld [vmem:[#allocation7 + $0x18] sm:$0xff]  ;;  %v529_v12 = vld [vmem:[#allocation7 + $0x10] sm:$0xff]  ;;  %s362_s27 = scalar_lea.vmem [#allocation11], %s1469_s17  ;;  %s903_s29 = sshll.u32 %s1278_s24, 7 }
  0x68   : > { %926 = vmatprep.subr.mxu1 %v1294_v0  ;;  %928 = vmatprep.mubr.msk.f32.mxu1 %vm1295_vm0, %v1294_v0  ;;  %v528_v13 = vld [vmem:[#allocation7 + $0x8] sm:$0xff]  ;;  %v534_v17 = vld [vmem:[#allocation8 + $0x18] sm:$0xff]  ;;  %v533_v18 = vld [vmem:[#allocation8 + $0x10] sm:$0xff]  ;;  %s721_s2 = scalar_lea.hbm %s1581_s6, %s903_s29  ;;  %s723_s11 = sshll.u32 %s362_s27, 4  ;;  %s724_s11 = int_to_ptr.vmem [resolvable:$true] %s723_s11 }
  0x69   : > { %922 = vmatpush3.xpose.msk.msra.mxu0 %vm365_vm1, %v364_v1  ;;  %927 = vmatpush3.msra.mxu1 %v364_v1  ;;  %v532_v19 = vld [vmem:[#allocation8 + $0x8] sm:$0xff]  ;;  %v531_v20 = vld [vmem:[#allocation8] sm:$0xff]  ;;  %s695_s13 = scalar_lea.sflag [#allocation12], %s1466_s12  ;;  %s1164_s10 = scalar_lea.vmem %s724_s11, 128 }
  0x6a   : > { %931 = vmatprep.subr.mxu1 %v1294_v0  ;;  %942 = vmatprep.subr.mxu0 %v1294_v0  ;;  %v527_v21 = vld [vmem:[#allocation7] sm:$0xff]  ;;  %p1165_p4 = scmp.ne.s32.totalorder %s724_s11, %s1164_s10  ;;  %s1296_s0 = smov [#allocation11]  }
  0x6b   : > { %s1168_s15 = sshll.u32 %s1296_s0, 4  ;;  %s1169_s15 = int_to_ptr.vmem [resolvable:$false] %s1168_s15 }
  0x6c   : > { %924 = vmatmul.mubr.msk.f32.vlgmr.msra.gmra.mxu0 %vm365_vm1, %v363_v2  ;;  %p1166_p3 = pnand %p1165_p4, %p1424_p9  ;;  %s1170_s16 = scalar_lea.vmem %s1169_s15, 256 }
  0x6d   : > { %950 = vmatprep.mubr.msk.f32.mxu0 %vm1295_vm0, %v1294_v0  ;;  %943 = vmatpush3.msra.mxu0 %v530_v11  ;;  %p1171_p13 = scmp.lt.s32.totalorder %s724_s11, %s1169_s15  ;;  %p1172_p5 = scmp.lt.s32.totalorder %s1170_s16, %s1164_s10 }
  0x6e   : > { %944 = vmatprep.subr.mxu0 %v1294_v0  ;;  %p1167_p7 = pneg %p1166_p3 }
  0x6f   : > { %945 = vmatpush3.msra.mxu0 %v529_v12  ;;  %p1173_p10 = por %p1172_p5, %p1171_p13 }
  0x70   : > { %946 = vmatprep.subr.mxu0 %v1294_v0 }
  0x71   : > { %947 = vmatpush3.msra.mxu0 %v528_v13  ;;  %p1174_p1 = pnand %p1173_p10, %p1167_p7 }
  0x72   : > { %948 = vmatprep.subr.mxu0 %v1294_v0 }
  0x73   : > { %949 = vmatpush3.msra.mxu0 %v527_v21 }
 0x12c   : > { %v438_v3 = vpop.f32.mrf.mxu0 }
 0x12d   : > { %v443_v4 = vsel %vm442_vm2, %v438_v3, -inf }
 0x12e   : > { %444 = vmax.xlane.f32.xlu0 %v443_v4  ;;  %v925_v5 = vpop.f32.mrf.mxu0 }
 0x1b7   : > { %v445_v6 = vpop.xlane.xlu0 %444 }
 0x1b8   : > { %v446_v7 = vsub.f32 %v438_v3, %v445_v6 }
 0x1ba   : > { %v447_v8 = vmul.f32 1.442695, %v446_v7 }
 0x1bc   : > { %1050 = vpow2.f32 %v447_v8 }
 0x1c9   : > { %v1051_v9 = vpop.eup %1050 }
 0x1ca   : > { %v449_v10 = vsel %vm442_vm2, %v1051_v9, 0.0 }
 0x1cb   : > { %450 = vadd.xlane.f32.xlu0 %v449_v10 }
 0x254   : > { %v451_v14 = vpop.xlane.xlu0 %450 }
 0x255   : > { %1052 = vrcp.f32 %v451_v14 }
 0x262   : > { %v1053_v15 = vpop.eup %1052 }
 0x263   : > { %v453_v16 = vmul.f32 %v1053_v15, %v1051_v9 }
 0x265   : > { %929 = vmatmul.mubr.msk.f32.vlgmr.msra.gmra.mxu1 %vm442_vm2, %v453_v16  ;;  %688 = vst.msk [vmem:[%s362_s27] sm:$0xff] %vm442_vm2, %v453_v16 }
 0x266   : > { %932 = vmatpush3.msra.mxu1 %v534_v17  ;;  %939 = vmatprep.mubr.msk.f32.mxu1 %vm1295_vm0, %v1294_v0 }
 0x267   : > { %933 = vmatprep.subr.mxu1 %v1294_v0 }
 0x268   : > { %934 = vmatpush3.msra.mxu1 %v533_v18 }
 0x269   : > { %935 = vmatprep.subr.mxu1 %v1294_v0 }
 0x26a   : > { %936 = vmatpush3.msra.mxu1 %v532_v19 }
 0x26b   : > { %937 = vmatprep.subr.mxu1 %v1294_v0 }
 0x26c   : > { %938 = vmatpush3.msra.mxu1 %v531_v20 }
 0x26d   : > { %940 = vmatmul.mubr.msk.f32.vlgmr.msra.gmra.mxu1 %vm365_vm1, %v363_v2 }
 0x325   : > { %v523_v22 = vpop.f32.mrf.mxu1 }
 0x326   : > { %951 = vmatmul.mubr.msk.f32.vlgmr.msra.gmra.mxu0 %vm365_vm1, %v523_v22 }
 0x327   : > { %v930_v23 = vpop.f32.mrf.mxu1 }
 0x32d   : > { %v601_v24 = vpop.f32.mrf.mxu1 }
 0x32f   : > { %v941_v25 = vpop.f32.mrf.mxu1 }
 0x330   : > { %1177 = shalt.err (!%p1174_p1)
}
 0x331   : > { %s1178_s1 = scalar_lea.hbm %s721_s2, 128  ;;  %s1182_s7 = scalar_lea.hbm %s1581_s6, 256 }
 0x332   : > { %p1179_p2 = scmp.ne.s32.totalorder %s721_s2, %s1178_s1  ;;  %p1183_p11 = scmp.lt.s32.totalorder %s721_s2, %s1581_s6 }
 0x333   : > { %p1184_p0 = scmp.lt.s32.totalorder %s1182_s7, %s1178_s1 }
 0x334   : > { %p1180_p6 = pnand %p1179_p2, %p1424_p9 }
 0x335   : > { %p1185_p12 = por %p1184_p0, %p1183_p11 }
 0x336   : > { %p1181_p8 = pneg %p1180_p6 }
 0x338   : > { %p1186_p4 = pnand %p1185_p12, %p1181_p8 }
 0x33a   : > { %1189 = shalt.err (!%p1186_p4)
}
 0x33b   : > { %966 = dma.vmem_to_hbm [thread:$0]  (%p1424_p9), %s724_s11, 128, %s721_s2, %s695_s13   ;;  %v900_v27 = vld [vmem:[%s1579_s4] ss:$0 sm:$0xff] }
 0x33c   : > { %s355_s10 = scalar_lea.vmem [#allocation10], %s1469_s17  ;;  %s1532_s1 = scalar_lea.hbm %s1580_s5, %s903_s29 }
 0x33d   : > { %s709_s0 = sshll.u32 %s355_s10, 4  ;;  %s690_s2 = scalar_lea.sflag [#allocation4], %s1466_s12  ;;  %s710_s0 = int_to_ptr.vmem [resolvable:$true] %s709_s0 }
 0x33e   : > { %s1190_s11 = scalar_lea.vmem %s710_s0, 128  ;;  %s1297_s13 = smov [#allocation10]  }
 0x33f   : > { %p1191_p3 = scmp.ne.s32.totalorder %s710_s0, %s1190_s11  ;;  %s1194_s19 = sshll.u32 %s1297_s13, 4  ;;  %s1195_s19 = int_to_ptr.vmem [resolvable:$false] %s1194_s19 }
 0x340   : > { %s1196_s17 = scalar_lea.vmem %s1195_s19, 256  ;;  %p1197_p5 = scmp.lt.s32.totalorder %s710_s0, %s1195_s19 }
 0x341   : > { %p1192_p7 = pnand %p1191_p3, %p1424_p9  ;;  %p1198_p10 = scmp.lt.s32.totalorder %s1196_s17, %s1190_s11 }
 0x343   : > { %p1193_p13 = pneg %p1192_p7  ;;  %p1199_p1 = por %p1198_p10, %p1197_p5 }
 0x345   : > { %p1200_p2 = pnand %p1199_p1, %p1193_p13 }
 0x3e6   : > { %v674_v26 = vpop.f32.mrf.mxu0 }
 0x3e7   : > { %v675_v28 = vadd.f32 %v674_v26, %v601_v24 }
 0x3e8   : > { %v952_v29 = vpop.f32.mrf.mxu0 }
 0x3e9   : > { %v685_v30 = vadd.f32 %v900_v27, %v675_v28 }
 0x3eb   : > { %1054 = vtanh.f32 %v685_v30 }
 0x3f8   : > { %v1055_v31 = vpop.eup %1054 }
 0x3f9   : > { %687 = vst.msk [vmem:[%s355_s10] sm:$0xff] %vm365_vm1, %v1055_v31 }
 0x3fa   : > { %1203 = shalt.err (!%p1200_p2)
}
 0x3fb   : > { %s1204_s24 = scalar_lea.hbm %s1532_s1, 128  ;;  %s1208_s3 = scalar_lea.hbm %s1580_s5, 256 }
 0x3fc   : > { %p1205_p6 = scmp.ne.s32.totalorder %s1532_s1, %s1204_s24  ;;  %p1209_p0 = scmp.lt.s32.totalorder %s1532_s1, %s1580_s5 }
 0x3fd   : > { %p1210_p12 = scmp.lt.s32.totalorder %s1208_s3, %s1204_s24 }
 0x3fe   : > { %p1206_p8 = pnand %p1205_p6, %p1424_p9 }
 0x3ff   : > { %p1211_p4 = por %p1210_p12, %p1209_p0 }
 0x400   : > { %p1207_p11 = pneg %p1206_p8 }
 0x402   : > { %p1212_p3 = pnand %p1211_p4, %p1207_p11 }
 0x404   : > { %1215 = shalt.err (!%p1212_p3)
}
 0x405   : > { %965 = dma.vmem_to_hbm [thread:$0]  (%p1424_p9), %s710_s0, 128, %s1532_s1, %s690_s2  }
 0x406 PF: > { %s735_s27 = sand.u32 1, %s1266_s21   ;;  %p1602_p7 = scmp.ne.s32.totalorder %s1588_s30, 0 }
 0x407   : > { %p1603_p13 = scmp.ge.s32.totalorder %s1286_s26, 2  ;;  %s736_s8 = scalar_lea.sflag [#allocation4], %s735_s27 }
 0x409   : > { %p984_p5 = pnand %p1603_p13, %p1602_p7 }
 0x40b   : > { %p985_p10 = pneg %p984_p5 }
 0x40d   : > { %1257 = dma.done.wait (%p985_p10), %s736_s8, 128  }
 0x40e   : > { %1259 = vsyncadd (%p985_p10), %s736_s8, 4294967168  ;;  %s745_s18 = scalar_lea.sflag [#allocation12], %s735_s27 }
 0x40f   : > { %1261 = dma.done.wait (%p985_p10), %s745_s18, 128  }
 0x410   : > { %1263 = vsyncadd (%p985_p10), %s745_s18, 4294967168  ;;  %s30_s26 = sadd.s32 1, %s1286_s26   ;;  %s1604_s21 = smov %s1270_s22 }
 0x411   : > { %p27_p1 = scmp.ge.s32.totalorder %s30_s26, 4   ;;  %s1605_s22 = smov %s1274_s23 }
 0x412   : > { %s1606_s23 = smov %s1433_s14  ;;  %s1607_s24 = smov %s1282_s25 }
 0x413   : > { %s1608_s25 = smov %s1610_s28  ;;  %29 = sbr.rel (!%p27_p1) target bundleno = 16 (0x10), region = 123 }
 0x418   :  { %750 = vsyncpa [#allocation3], 1 }
 0x419   :  { %752 = vsyncpa [#allocation3 + $0x1], 1 }
 0x41a   :  { %753 = vsyncpa [#allocation6], 1 }
 0x41b   :  { %755 = vsyncpa [#allocation6 + $0x1], 1 }
 0x41c   :  { %756 = vsyncpa [#allocation9], 1 }
 0x41d   :  { %757 = vsyncpa [#allocation4], 1 }
 0x41e   :  { %759 = vsyncpa [#allocation4 + $0x1], 1 }
 0x41f   :  { %760 = vsyncpa [#allocation12], 1 }
 0x420   :  { %762 = vsyncpa [#allocation12 + $0x1], 1 }

</bundles_post_ra>
